<compile_context>
chip_gen: v7x
topology: tpu7x:2x2x1
jax: 0.10.0
libtpu: 0.0.40
codegen_flags: <defaults>
</compile_context>

<pallas_src>
import numpy as np
import jax
import jax.numpy as jnp
from jax.experimental import pallas as pl
from jax.experimental.pallas import tpu as pltpu


# ----------------------------- Pallas kernel ------------------------------ #
def _rope2d_kernel(x_ref, cos_ref, sin_ref, y_ref):
    # x_ref   : (1, H, TC)  -- one batch's heads x one lane-dense chunk of S*D
    # cos_ref : (1, 1, TC)  -- interleaved cos table, float32 (broadcast over H)
    # sin_ref : (1, 1, TC)  -- interleaved, sign-baked sin table, float32
    x = x_ref[...].astype(jnp.float32)          # f32 math even for bf16 inputs
    c = cos_ref[...]
    s = sin_ref[...]

    # Swap within even/odd pairs along the flattened (seq, head_dim) axis:
    #   swap(x)[2k] = x[2k+1], swap(x)[2k+1] = x[2k]
    # TC is even, so tile-local parity equals global parity, and the roll
    # wrap-around lanes are never selected by the parity mask.
    left = jnp.roll(x, -1, axis=-1)             # left[i]  = x[i+1]
    right = jnp.roll(x, 1, axis=-1)             # right[i] = x[i-1]
    lane = jax.lax.broadcasted_iota(jnp.int32, x.shape, dimension=x.ndim - 1)
    x_swap = jnp.where(lane % 2 == 0, left, right)

    # Pure FMA; sign of sin already baked in ([-s, s] pattern).
    y_ref[...] = (x * c + x_swap * s).astype(y_ref.dtype)


# ------------------------------ JAX wrapper -------------------------------- #
def build_rope2d_tables(head_dim, max_height, max_width, base=10000.0):
    """Deterministic parameter construction (mirrors Rope2D.__init__)."""
    assert head_dim % 2 == 0
    inv_freq = 1.0 / (base ** (jnp.arange(0, head_dim, 2, dtype=jnp.float32) / head_dim))
    h_angles = jnp.arange(max_height, dtype=jnp.float32)[:, None] * inv_freq[None, :]
    w_angles = jnp.arange(max_width, dtype=jnp.float32)[:, None] * inv_freq[None, :]
    return jnp.sin(h_angles), jnp.cos(h_angles), jnp.sin(w_angles), jnp.cos(w_angles)


def _pick_col_tile(sd, n_head, itemsize, max_block_bytes=4 << 20):
    """Largest lane-dense column tile: a multiple of 128 that divides S*D and
    keeps one (n_head, TC) x-block under max_block_bytes. Falls back to the
    full row if S*D is not a multiple of 128 (still correct, masked stores)."""
    if sd % 128 != 0:
        return sd
    tc = sd
    while tc % 256 == 0 and n_head * tc * itemsize > max_block_bytes:
        tc //= 2
    return tc


def rope2d_forward(x, positions, h_sin, h_cos, w_sin, w_cos):
    """Exact re-implementation of Rope2D.forward.

    x:         [B, n_head, S, head_dim]
    positions: [B, S, 2] int32 (row, col)
    returns    [B, n_head, S, head_dim], same dtype as x
    """
    B, H, S, D = x.shape
    assert D % 2 == 0
    del w_sin, w_cos  # built by the module but unused by its forward pass

    # --- glue (table-sized): gather per-(batch, seq) row tables and interleave
    # to match x's even/odd pair layout along head_dim ---
    h_pos = positions[..., 0]                                        # [B, S]
    cos_g = h_cos[h_pos].astype(jnp.float32)                         # [B, S, D//2]
    sin_g = h_sin[h_pos].astype(jnp.float32)                         # [B, S, D//2]
    cos_i = jnp.stack([cos_g, cos_g], axis=-1).reshape(B, 1, S * D)  # [c0,c0,c1,c1,...]
    sin_i = jnp.stack([-sin_g, sin_g], axis=-1).reshape(B, 1, S * D) # [-s0,s0,-s1,s1,...]

    # --- lane-dense view of x: collapse (S, D) -> S*D (free, contiguous) ---
    SD = S * D
    x_flat = x.reshape(B, H, SD)

    TC = _pick_col_tile(SD, H, x.dtype.itemsize)
    n_col = SD // TC   # TC divides SD by construction

    # VMEM budget: double-buffered x/y blocks + cos/sin blocks, with headroom.
    # Clamp to 48 MiB: safe on v7x (64 MiB physical), raises the scoped default
    # on v5e (16 MiB) / v6e (32 MiB) when large tiles are used.
    block_bytes = 2 * (2 * H * TC * x.dtype.itemsize + 2 * TC * 4)
    vmem_limit = int(min(48 << 20, max(32 << 20, 4 * block_bytes)))

    y_flat = pl.pallas_call(
        _rope2d_kernel,
        out_shape=jax.ShapeDtypeStruct((B, H, SD), x.dtype),
        grid=(B, n_col),
        in_specs=[
            pl.BlockSpec((1, H, TC), lambda b, j: (b, 0, j)),   # x (interleaved pairs)
            pl.BlockSpec((1, 1, TC), lambda b, j: (b, 0, j)),   # cos, interleaved
            pl.BlockSpec((1, 1, TC), lambda b, j: (b, 0, j)),   # sin, signed + interleaved
        ],
        out_specs=pl.BlockSpec((1, H, TC), lambda b, j: (b, 0, j)),
        compiler_params=pltpu.CompilerParams(
            dimension_semantics=("parallel", "parallel"),
            vmem_limit_bytes=vmem_limit,
        ),
    )(x_flat, cos_i, sin_i)

    return y_flat.reshape(B, H, S, D)


def rope2d_reference(x, positions, h_sin, h_cos, w_sin, w_cos):
    """Faithful pure-JAX transcription of the PyTorch forward (validation only)."""
    B, H, S, D = x.shape
    Dh = D // 2
    hs = h_sin[positions[..., 0]]
    hc = h_cos[positions[..., 0]]
    ws = w_sin[positions[..., 1]]
    wc = w_cos[positions[..., 1]]
    sin = jnp.concatenate([hs, ws], axis=-1)[:, None, :, :Dh]
    cos = jnp.concatenate([hc, wc], axis=-1)[:, None, :, :Dh]
    xr = x.reshape(B, H, S, Dh, 2)
    x1, x2 = xr[..., 0], xr[..., 1]
    out = jnp.stack([x1 * cos - x2 * sin, x1 * sin + x2 * cos], axis=-1)
    return out.reshape(B, H, S, D)


if __name__ == "__main__":
    # Small, deterministic example shapes.
    B, H, S, D = 2, 4, 8, 32
    MAX_HEIGHT, MAX_WIDTH = 16, 16

    h_sin, h_cos, w_sin, w_cos = build_rope2d_tables(D, MAX_HEIGHT, MAX_WIDTH)

    key = jax.random.PRNGKey(0)
    kx, kp = jax.random.split(key)
    x = jax.random.normal(kx, (B, H, S, D), dtype=jnp.float32)
    rows = jax.random.randint(kp, (B, S, 1), 0, MAX_HEIGHT, dtype=jnp.int32)
    cols = jax.random.randint(jax.random.fold_in(kp, 1), (B, S, 1), 0, MAX_WIDTH,
                              dtype=jnp.int32)
    positions = jnp.concatenate([rows, cols], axis=-1)   # [B, S, 2]

    out = rope2d_forward(x, positions, h_sin, h_cos, w_sin, w_cos)
    out = jax.block_until_ready(out)

    ref = rope2d_reference(x, positions, h_sin, h_cos, w_sin, w_cos)
    assert out.shape == x.shape and out.dtype == x.dtype
    np.testing.assert_allclose(np.asarray(out), np.asarray(ref), rtol=1e-6, atol=1e-6)

    print("KERNEL_OK")
</pallas_src>

<mosaic_0001>
module attributes {stable_mosaic.version = 11 : i64} {
  func.func @_rope2d_kernel(%arg0: i32, %arg1: i32, %arg2: memref<1x4x256xf32, #tpu.memory_space<vmem>>, %arg3: memref<1x1x256xf32, #tpu.memory_space<vmem>>, %arg4: memref<1x1x256xf32, #tpu.memory_space<vmem>>, %arg5: memref<1x4x256xf32, #tpu.memory_space<vmem>>) attributes {dimension_semantics = [#tpu.dimension_semantics<parallel>, #tpu.dimension_semantics<parallel>], iteration_bounds = array<i64: 2, 1>, scalar_prefetch = 0 : i64, scratch_operands = 0 : i64, tpu.core_type = #tpu.core_type<tc>, window_params = [{transform_indices = @transform_0, window_bounds = array<i64: 1, 4, 256>}, {transform_indices = @transform_1, window_bounds = array<i64: 1, 1, 256>}, {transform_indices = @transform_2, window_bounds = array<i64: 1, 1, 256>}, {transform_indices = @transform_3, window_bounds = array<i64: 1, 4, 256>}]} {
    %c0 = arith.constant 0 : index
    %c0_0 = arith.constant 0 : index
    %c0_1 = arith.constant 0 : index
    %0 = vector.load %arg2[%c0, %c0_0, %c0_1] : memref<1x4x256xf32, #tpu.memory_space<vmem>>, vector<1x4x256xf32>
    %c0_2 = arith.constant 0 : index
    %c0_3 = arith.constant 0 : index
    %c0_4 = arith.constant 0 : index
    %1 = vector.load %arg3[%c0_2, %c0_3, %c0_4] : memref<1x1x256xf32, #tpu.memory_space<vmem>>, vector<1x1x256xf32>
    %c0_5 = arith.constant 0 : index
    %c0_6 = arith.constant 0 : index
    %c0_7 = arith.constant 0 : index
    %2 = vector.load %arg4[%c0_5, %c0_6, %c0_7] : memref<1x1x256xf32, #tpu.memory_space<vmem>>, vector<1x1x256xf32>
    %3 = vector.extract_strided_slice %0 {offsets = [0, 0, 1], sizes = [1, 4, 255], strides = [1, 1, 1]} : vector<1x4x256xf32> to vector<1x4x255xf32>
    %4 = vector.extract_strided_slice %0 {offsets = [0, 0, 0], sizes = [1, 4, 1], strides = [1, 1, 1]} : vector<1x4x256xf32> to vector<1x4x1xf32>
    %5 = tpu.concatenate %3, %4 in 2 : vector<1x4x255xf32>, vector<1x4x1xf32> -> vector<1x4x256xf32>
    %6 = vector.extract_strided_slice %0 {offsets = [0, 0, 255], sizes = [1, 4, 1], strides = [1, 1, 1]} : vector<1x4x256xf32> to vector<1x4x1xf32>
    %7 = vector.extract_strided_slice %0 {offsets = [0, 0, 0], sizes = [1, 4, 255], strides = [1, 1, 1]} : vector<1x4x256xf32> to vector<1x4x255xf32>
    %8 = tpu.concatenate %6, %7 in 2 : vector<1x4x1xf32>, vector<1x4x255xf32> -> vector<1x4x256xf32>
    %9 = tpu.iota {dimensions = array<i32: 2>} : vector<1x4x256xi32>
    %c2_i32 = arith.constant 2 : i32
    %c0_i32 = arith.constant 0 : i32
    %10 = arith.cmpi eq, %c2_i32, %c0_i32 : i32
    %c1_i32 = arith.constant 1 : i32
    %11 = arith.select %10, %c1_i32, %c2_i32 : i32
    %12 = vector.broadcast %11 : i32 to vector<1x4x256xi32>
    %13 = arith.remsi %9, %12 : vector<1x4x256xi32>
    %c0_i32_8 = arith.constant 0 : i32
    %14 = vector.broadcast %c0_i32_8 : i32 to vector<1x4x256xi32>
    %15 = arith.cmpi ne, %13, %14 : vector<1x4x256xi32>
    %c0_i32_9 = arith.constant 0 : i32
    %16 = vector.broadcast %c0_i32_9 : i32 to vector<1x4x256xi32>
    %17 = arith.cmpi slt, %13, %16 : vector<1x4x256xi32>
    %c0_i32_10 = arith.constant 0 : i32
    %18 = arith.cmpi slt, %11, %c0_i32_10 : i32
    %19 = vector.broadcast %18 : i1 to vector<1x4x256xi1>
    %20 = vector.broadcast %19 : vector<1x4x256xi1> to vector<1x4x256xi1>
    %21 = arith.xori %17, %20 : vector<1x4x256xi1>
    %22 = arith.andi %21, %15 : vector<1x4x256xi1>
    %23 = vector.broadcast %11 : i32 to vector<1x4x256xi32>
    %24 = arith.addi %13, %23 : vector<1x4x256xi32>
    %25 = arith.select %22, %24, %13 : vector<1x4x256xi1>, vector<1x4x256xi32>
    %c0_i32_11 = arith.constant 0 : i32
    %26 = vector.broadcast %c0_i32_11 : i32 to vector<1x4x256xi32>
    %27 = arith.cmpi eq, %25, %26 : vector<1x4x256xi32>
    %28 = arith.select %27, %5, %8 : vector<1x4x256xi1>, vector<1x4x256xf32>
    %29 = vector.broadcast %1 : vector<1x1x256xf32> to vector<1x4x256xf32>
    %30 = arith.mulf %0, %29 : vector<1x4x256xf32>
    %31 = vector.broadcast %2 : vector<1x1x256xf32> to vector<1x4x256xf32>
    %32 = arith.mulf %28, %31 : vector<1x4x256xf32>
    %33 = arith.addf %30, %32 : vector<1x4x256xf32>
    %c0_12 = arith.constant 0 : index
    %c0_13 = arith.constant 0 : index
    %c0_14 = arith.constant 0 : index
    %34 = vector.load %arg5[%c0_12, %c0_13, %c0_14] : memref<1x4x256xf32, #tpu.memory_space<vmem>>, vector<1x4x256xf32>
    tpu.vector_store %arg5[%c0_12, %c0_13, %c0_14], %33 {strides = array<i32>} : memref<1x4x256xf32, #tpu.memory_space<vmem>>, vector<1x4x256xf32>,
    return
  }
  func.func @transform_0(%arg0: i32, %arg1: i32) -> (i32, i32, i32) {
    %c0_i32 = arith.constant 0 : i32
    %c0_i32_0 = arith.constant 0 : i32
    return %arg0, %c0_i32, %arg1 : i32, i32, i32
  }
  func.func @transform_1(%arg0: i32, %arg1: i32) -> (i32, i32, i32) {
    %c0_i32 = arith.constant 0 : i32
    %c0_i32_0 = arith.constant 0 : i32
    return %arg0, %c0_i32, %arg1 : i32, i32, i32
  }
  func.func @transform_2(%arg0: i32, %arg1: i32) -> (i32, i32, i32) {
    %c0_i32 = arith.constant 0 : i32
    %c0_i32_0 = arith.constant 0 : i32
    return %arg0, %c0_i32, %arg1 : i32, i32, i32
  }
  func.func @transform_3(%arg0: i32, %arg1: i32) -> (i32, i32, i32) {
    %c0_i32 = arith.constant 0 : i32
    %c0_i32_0 = arith.constant 0 : i32
    return %arg0, %c0_i32, %arg1 : i32, i32, i32
  }
}

</mosaic_0001>

<bundles_post_ra>
// kernel: tpu_custom_call.1
= control target key start
LH: loop header
LB: loop body
LE: loop exit
PB: predicated region body
PF: predicated region fallthrough
CT: control target
= control target key end

     0   :  { %8 = vsyncpa [#allocation3], 0  ;;  %s1002_s0 = inlined_call_operand.hbm [shape: f32[2,4,256], index: 0, kind: input, shape index: {}]   ;;  %s1003_s1 = inlined_call_operand.hbm [shape: f32[2,1,256], index: 1, kind: input, shape index: {}]   ;;  %s1004_s2 = inlined_call_operand.vmem [shape: f32[2,1,256], index: 2, kind: input, shape index: {}]   ;;  %s1005_s3 = inlined_call_operand.hbm [shape: f32[2,4,256], index: 3, kind: output, shape index: {}]  }
   0x1   :  { %10 = vsyncpa [#allocation3 + $0x1], 0 }
   0x2   :  { %11 = vsyncpa [#allocation6], 0 }
   0x3   :  { %13 = vsyncpa [#allocation6 + $0x1], 0 }
   0x4   :  { %14 = vsyncpa [#allocation4], 0 }
   0x5   :  { %16 = vsyncpa [#allocation4 + $0x1], 0  ;;  %s778_s12 = smov 0   ;;  %s780_s13 = smov 0  }
   0x6   :  { %s782_s14 = smov 0   ;;  %s784_s15 = smov 0  }
   0x7   :  { %s786_s16 = smov 0   ;;  %s788_s17 = smov 0  }
   0x8 LB: > { %s512_s18 = sadd.s32 4294967295, %s751_s17   ;;  %s513_s19 = sadd.s32 4294967294, %s751_s17   ;;  %s751_s17 = sphi %s788_s17, %s22_s17   ;;  %s747_s16 = sphi %s786_s16, %s1025_s16   ;;  %s743_s15 = sphi %s784_s15, %s1024_s15   ;;  %s739_s14 = sphi %s782_s14, %s1023_s14   ;;  %s735_s13 = sphi %s780_s13, %s1022_s13   ;;  %s731_s12 = sphi %s778_s12, %s1021_s12  }
   0x9   : > { %s34_s20 = sadd.s32 1, %s747_s16  ;;  %s43_s21 = sadd.s32 1, %s739_s14 }
   0xa   : > { %p36_p0 = scmp.ge.s32.totalorder %s34_s20, 2  ;;  %p50_p1 = scmp.ne.s32.totalorder %s739_s14, %s735_s13 }
   0xb   : > { %p51_p2 = scmp.eq.s32.totalorder %s751_s17, 0  ;;  %p56_p3 = scmp.ne.s32.totalorder %s735_s13, %s731_s12 }
   0xc   : > { %s1027_s20 = smov (%p36_p0, %s34_s20), 0  ;;  %p57_p5 = scmp.eq.s32.totalorder %s512_s18, 0 }
   0xd   : > { %p819_p4 = por %p51_p2, %p50_p1  ;;  %s38_s23 = ssub.s32 %s747_s16, %s1027_s20 }
   0xe   : > { %p138_p6 = scmp.eq.s32.totalorder %s512_s18, 1  ;;  %p41_p7 = scmp.eq.s32.totalorder %s38_s23, 0 }
   0xf   : > { %p825_p8 = por %p57_p5, %p56_p3  ;;  %p144_p10 = scmp.eq.s32.totalorder %s513_s19, 1 }
  0x10   : > { %p829_p9 = por %p138_p6, %p50_p1  ;;  %p552_p13 = scmp.lt.s32.totalorder %s751_s17, 2 }
  0x11   : > { %s1009_s24 = scalar_select %p825_p8, 1, 0 }
  0x12   : > { %s1010_s25 = scalar_select %p829_p9, 1, 0 }
  0x13   : > { %s834_s26 = scalar_select %p41_p7, %s739_s14, %s43_s21  }
  0x14   : > { %p836_p11 = por %p144_p10, %p56_p3  ;;  %s843_s28 = sand.u32 1, %s739_s14  }
  0x15   : > { %s516_s29 = sshll.u32 %s843_s28, 3  ;;  %s532_s30 = sshll.u32 %s747_s16, 7 }
  0x16   : > { %s1011_s27 = scalar_select %p836_p11, 1, 0 }
  0x17   : > { %s850_s6 = scalar_lea.hbm %s1002_s0, %s532_s30  ;;  %s168_s7 = scalar_lea.vmem [#allocation2], %s516_s29 }
  0x18   : > { %s178_s8 = sshll.u32 %s168_s7, 4  ;;  %p856_p0 = pnand %p552_p13, %p819_p4  ;;  %s852_s8 = int_to_ptr.vmem [resolvable:$true] %s178_s8 }
  0x19   : > { %s165_s10 = scalar_lea.sflag [#allocation3], %s843_s28  ;;  %s605_s11 = scalar_lea.hbm %s850_s6, 128 }
  0x1a   : > { %p606_p3 = scmp.ne.s32.totalorder %s850_s6, %s605_s11  ;;  %p607_p5 = pneg %p856_p0 }
  0x1b   : > { %s610_s21 = scalar_lea.hbm %s1002_s0, 256  ;;  %p611_p4 = scmp.lt.u32.totalorder %s850_s6, %s1002_s0 }
  0x1c   : > { %p608_p6 = pnand %p607_p5, %p606_p3  ;;  %p612_p10 = scmp.lt.u32.totalorder %s610_s21, %s605_s11 }
  0x1d   : > { %p614_p12 = scmp.lt.u32.totalorder %s605_s11, %s850_s6 }
  0x1e   : > { %p609_p7 = pneg %p608_p6  ;;  %p613_p13 = por %p612_p10, %p611_p4 }
  0x20   : > { %p615_p1 = por %p614_p12, %p613_p13 }
  0x22   : > { %p616_p2 = pnand %p615_p1, %p609_p7 }
  0x24   : > { %619 = shalt.err (!%p616_p2)
}
  0x25   : > { %s620_s29 = scalar_lea.vmem %s852_s8, 128  ;;  %s753_s30 = smov [#allocation2]  }
  0x26   : > { %p621_p3 = scmp.ne.s32.totalorder %s852_s8, %s620_s29  ;;  %s625_s4 = sshll.u32 %s753_s30, 4  ;;  %s626_s4 = int_to_ptr.vmem [resolvable:$false] %s625_s4 }
  0x27   : > { %s627_s5 = scalar_lea.vmem %s626_s4, 256  ;;  %p628_p9 = scmp.lt.s32.totalorder %s852_s8, %s626_s4 }
  0x28   : > { %p623_p6 = pnand %p621_p3, %p607_p5  ;;  %p629_p4 = scmp.lt.s32.totalorder %s627_s5, %s620_s29 }
  0x2a   : > { %p624_p11 = pneg %p623_p6  ;;  %p630_p10 = por %p629_p4, %p628_p9 }
  0x2c   : > { %p631_p12 = pnand %p630_p10, %p624_p11 }
  0x2e   : > { %634 = shalt.err (!%p631_p12)
}
  0x2f   : > { %544 = dma.hbm_to_vmem [thread:$0]  (!%p856_p0), %s850_s6, 128, %s852_s8, %s165_s10  }
  0x30   : > { %p1013_p1 = scmp.lt.s32.totalorder %s751_s17, 3  ;;  %p1014_p2 = scmp.ge.s32.totalorder %s751_s17, 1 }
  0x31   : > { %s519_s11 = sshll.u32 %s843_s28, 1  ;;  %s533_s18 = sshll.u32 %s747_s16, 5 }
  0x32   : > { %p892_p7 = pnand %p1014_p2, %p1013_p1  ;;  %s901_s22 = scalar_lea.hbm %s1003_s1, %s533_s18 }
  0x33   : > { %s189_s23 = scalar_lea.vmem [#allocation5], %s519_s11  ;;  %s186_s6 = scalar_lea.sflag [#allocation6], %s843_s28 }
  0x34   : > { %s1015_s7 = scalar_select %p892_p7, 1, 0 }
  0x35   : > { %s199_s29 = sshll.u32 %s189_s23, 4  ;;  %s635_s8 = scalar_lea.hbm %s901_s22, 32  ;;  %s200_s29 = int_to_ptr.vmem [resolvable:$true] %s199_s29 }
  0x36   : > { %p636_p9 = scmp.ne.s32.totalorder %s901_s22, %s635_s8  ;;  %s640_s4 = scalar_lea.hbm %s1003_s1, 64 }
  0x37   : > { %p641_p3 = scmp.lt.u32.totalorder %s901_s22, %s1003_s1  ;;  %p642_p6 = scmp.lt.u32.totalorder %s640_s4, %s635_s8 }
  0x38   : > { %p638_p11 = pnand %p636_p9, %p607_p5  ;;  %p644_p10 = scmp.lt.u32.totalorder %s635_s8, %s901_s22 }
  0x39   : > { %p643_p4 = por %p642_p6, %p641_p3 }
  0x3a   : > { %p639_p13 = pneg %p638_p11 }
  0x3b   : > { %p645_p12 = por %p644_p10, %p643_p4 }
  0x3d   : > { %p646_p1 = pnand %p645_p12, %p639_p13 }
  0x3f   : > { %649 = shalt.err (!%p646_p1)
}
  0x40   : > { %s650_s28 = scalar_lea.vmem %s200_s29, 32  ;;  %s754_s11 = smov [#allocation5]  }
  0x41   : > { %p651_p2 = scmp.ne.s32.totalorder %s200_s29, %s650_s28  ;;  %s655_s19 = sshll.u32 %s754_s11, 4  ;;  %s656_s19 = int_to_ptr.vmem [resolvable:$false] %s655_s19 }
  0x42   : > { %s657_s21 = scalar_lea.vmem %s656_s19, 64  ;;  %p658_p8 = scmp.lt.s32.totalorder %s200_s29, %s656_s19 }
  0x43   : > { %p653_p9 = pnand %p651_p2, %p607_p5  ;;  %p659_p7 = scmp.lt.s32.totalorder %s657_s21, %s650_s28 }
  0x45   : > { %p654_p11 = pneg %p653_p9  ;;  %p660_p3 = por %p659_p7, %p658_p8 }
  0x47   : > { %p661_p6 = pnand %p660_p3, %p654_p11 }
  0x49   : > { %664 = shalt.err (!%p661_p6)
}
  0x4a   : > { %547 = dma.hbm_to_vmem [thread:$0]  (!%p856_p0), %s901_s22, 32, %s200_s29, %s186_s6  }
  0x4b   : > { %p1016_p13 = scmp.ne.s32.totalorder %s1015_s7, 0 }
  0x4c   : > { %s926_s23 = sand.u32 (!%p1016_p13), 1, %s735_s13   ;;  %p1017_p8 = scmp.ne.s32.totalorder (!%p1016_p13), %s1009_s24, 0 }
  0x4d   : > { %220 = sbr.rel (%p1016_p13) target bundleno = 232 (0xe8), region = 32  ;;  %s523_s8 = sshll.u32 (!%p1016_p13), %s926_s23, 3 }
  0x4e   : > { %s223_s10 = scalar_lea.sflag (!%p1016_p13), [#allocation3], %s926_s23  ;;  %s226_s30 = scalar_lea.vmem (!%p1016_p13), [#allocation2], %s523_s8 }
  0x54   : > { %718 = dma.done.wait (%p1017_p8), %s223_s10, 128  }
  0x55   : > { %720 = vsyncadd (%p1017_p8), %s223_s10, 4294967168  ;;  %s524_s9 = sshll.u32 %s926_s23, 1  ;;  %s232_s7 = scalar_lea.sflag [#allocation6], %s926_s23 }
  0x56   : > { %s235_s22 = scalar_lea.vmem [#allocation5], %s524_s9 }
  0x57   : > { %722 = dma.done.wait (%p1017_p8), %s232_s7, 32  }
  0x58   : > { %724 = vsyncadd (%p1017_p8), %s232_s7, 4294967264  ;;  %v283_v0 = vld [vmem:[%s226_s30] sm:$0xff]  ;;  %s755_s29 = smov 127   ;;  %s756_s6 = smov 1   ;;  %v308_v2 = vlaneseq  ;;  %v284_v8 = vld [vmem:[%s235_s22] sm:$0x3] }
  0x59   : > { %288 = vrot.lane.b32.xlu0 %v283_v0, %s755_s29  ;;  %v287_v1 = vcombine.high %v283_v0, %v283_v0  ;;  %p274_p0 = scmp.lt.s32.totalorder %s743_s15, 1  ;;  %vm292_vm0 = vcmask 1039360   ;;  %vm303_vm1 = vcmask 7168   ;;  %s534_s11 = sshll.u32 %s743_s15, 7 }
  0x5a   : > { %v341_v3 = vshrl.u32 %v308_v2, 7  ;;  %v309_v4 = vand.u32 127, %v308_v2  ;;  %s270_s19 = scalar_lea.vmem [#allocation7], %s523_s8  ;;  %s953_s9 = scalar_lea.hbm %s1005_s3, %s534_s11 }
  0x5b   : > { %298 = vrot.lane.b32.xlu1 %v287_v1, %s756_s6  ;;  %s275_s4 = scalar_select %p274_p0, %s743_s15, 1 }
  0x5c   : > { %v342_v5 = vsub.s32 0, %v341_v3  ;;  %v346_v6 = vsub.s32 1, %v341_v3  ;;  %v310_v7 = vadd.s32 128, %v309_v4  ;;  %v315_v10 = vand.u32 1, %v309_v4  ;;  %s387_s21 = sshll.u32 %s270_s19, 4  ;;  %s371_s7 = scalar_lea.sflag [#allocation4], %s926_s23  ;;  %s955_s21 = int_to_ptr.vmem [resolvable:$true] %s387_s21 }
  0x5d   : > { %290 = vrot.lane.b32.xlu0 %v287_v1, %s755_s29  ;;  %s526_s5 = sshll.u32 %s275_s4, 1  ;;  %s665_s22 = scalar_lea.vmem %s955_s21, 128 }
  0x5e   : > { %s280_s28 = scalar_lea.vmem %s1004_s2, %s526_s5  ;;  %v343_v11 = vrot.slane %v284_v8, %v342_v5  ;;  %v347_v12 = vrot.slane %v284_v8, %v346_v6  ;;  %v322_v13 = vand.u32 1, %v310_v7  ;;  %vm335_vm2 = vcmp.eq.s32.totalorder %v315_v10, 0  ;;  %p666_p5 = scmp.ne.s32.totalorder %s955_s21, %s665_s22 }
  0x5f   : > { %301 = vrot.lane.b32.xlu1 %v283_v0, %s756_s6  ;;  %v285_v15 = vld [vmem:[%s280_s28] sm:$0x3]  ;;  %p1018_p7 = scmp.ne.s32.totalorder %s1010_s25, 0  ;;  %s757_s15 = smov [#allocation7]  }
  0x60   : > { %v348_v17 = vcombine.low %v343_v11, %v347_v12  ;;  %vm336_vm3 = vcmp.eq.s32.totalorder %v322_v13, 0  ;;  %v355_v18 = vrot.slane %v285_v15, %v342_v5  ;;  %v359_v19 = vrot.slane %v285_v15, %v346_v6  ;;  %s669_s8 = sshll.u32 %s757_s15, 4  ;;  %s670_s8 = int_to_ptr.vmem [resolvable:$false] %s669_s8 }
  0x61   : > { %p667_p4 = pnand %p666_p5, %p1018_p7  ;;  %s671_s29 = scalar_lea.vmem %s670_s8, 256 }
  0x62   : > { %v350_v27 = vmul.f32 %v348_v17, %v283_v0  ;;  %p672_p12 = scmp.lt.s32.totalorder %s955_s21, %s670_s8  ;;  %p673_p1 = scmp.lt.s32.totalorder %s671_s29, %s665_s22 }
  0x63   : > { %p668_p10 = pneg %p667_p4 }
  0x64   : > { %p674_p2 = por %p673_p1, %p672_p12 }
  0x66   : > { %p675_p9 = pnand %p674_p2, %p668_p10 }
  0xcb   : > { %v289_v9 = vpop.permute.xlu0 %288 }
  0xcd   : > { %v299_v14 = vpop.permute.xlu1 %298 }
  0xcf   : > { %v291_v16 = vpop.permute.xlu0 %290 }
  0xd0   : > { %v293_v21 = vsel %vm292_vm0, %v289_v9, %v291_v16  ;;  %v297_v22 = vsel %vm292_vm0, %v291_v16, %v289_v9 }
  0xd1   : > { %v302_v20 = vpop.permute.xlu1 %301 }
  0xd2   : > { %v304_v23 = vsel %vm303_vm1, %v302_v20, %v299_v14  ;;  %v307_v24 = vsel %vm303_vm1, %v299_v14, %v302_v20 }
  0xd3   : > { %v337_v25 = vsel %vm335_vm2, %v293_v21, %v307_v24  ;;  %v338_v26 = vsel %vm336_vm3, %v297_v22, %v304_v23 }
  0xd4   : > { %v362_v28 = vmul.f32 %v355_v18, %v337_v25  ;;  %v363_v29 = vmul.f32 %v359_v19, %v338_v26 }
  0xd6   : > { %v366_v30 = vcombine.low %v362_v28, %v363_v29 }
  0xd8   : > { %v368_v31 = vadd.f32 %v366_v30, %v350_v27 }
  0xda   : > { %369 = vst [vmem:[%s270_s19] sm:$0xff] %v368_v31 }
  0xdb   : > { %678 = shalt.err (!%p675_p9)
}
  0xdc   : > { %s679_s23 = scalar_lea.hbm %s953_s9, 128  ;;  %s683_s5 = scalar_lea.hbm %s1005_s3, 256 }
  0xdd   : > { %p680_p11 = scmp.ne.s32.totalorder %s953_s9, %s679_s23  ;;  %p684_p13 = scmp.lt.u32.totalorder %s953_s9, %s1005_s3 }
  0xde   : > { %p685_p8 = scmp.lt.u32.totalorder %s683_s5, %s679_s23  ;;  %p687_p5 = scmp.lt.u32.totalorder %s679_s23, %s953_s9 }
  0xdf   : > { %p681_p3 = pnand %p680_p11, %p1018_p7 }
  0xe0   : > { %p686_p0 = por %p685_p8, %p684_p13 }
  0xe1   : > { %p682_p6 = pneg %p681_p3 }
  0xe2   : > { %p688_p4 = por %p687_p5, %p686_p0 }
  0xe4   : > { %p689_p10 = pnand %p688_p4, %p682_p6 }
  0xe6   : > { %692 = shalt.err (!%p689_p10)
}
  0xe7   : > { %539 = dma.vmem_to_hbm [thread:$0]  (%p1018_p7), %s955_s21, 128, %s953_s9, %s371_s7  }
  0xe8 PF: > { %s399_s28 = sand.u32 1, %s731_s12   ;;  %p1019_p12 = scmp.ne.s32.totalorder %s1011_s27, 0 }
  0xe9   : > { %p1020_p1 = scmp.ge.s32.totalorder %s751_s17, 2  ;;  %s400_s11 = scalar_lea.sflag [#allocation4], %s399_s28 }
  0xeb   : > { %p549_p2 = pnand %p1020_p1, %p1019_p12 }
  0xed   : > { %726 = dma.done.wait (!%p549_p2), %s400_s11, 128  }
  0xee   : > { %728 = vsyncadd (!%p549_p2), %s400_s11, 4294967168  ;;  %s22_s17 = sadd.s32 1, %s751_s17   ;;  %s1021_s12 = smov %s735_s13 }
  0xef   : > { %p19_p9 = scmp.ge.s32.totalorder %s22_s17, 4   ;;  %s1022_s13 = smov %s739_s14 }
  0xf0   : > { %s1023_s14 = smov %s834_s26  ;;  %s1024_s15 = smov %s747_s16 }
  0xf1   : > { %s1025_s16 = smov %s1027_s20  ;;  %21 = sbr.rel (!%p19_p9) target bundleno = 8 (0x8), region = 93 }
  0xf8   :  { %405 = vsyncpa [#allocation3], 1 }
  0xf9   :  { %407 = vsyncpa [#allocation3 + $0x1], 1 }
  0xfa   :  { %408 = vsyncpa [#allocation6], 1 }
  0xfb   :  { %410 = vsyncpa [#allocation6 + $0x1], 1 }
  0xfc   :  { %411 = vsyncpa [#allocation4], 1 }
  0xfd   :  { %413 = vsyncpa [#allocation4 + $0x1], 1 }

</bundles_post_ra>
